<compile_context>
chip_gen: v5e
topology: v5e:2x2
jax: 0.10.0
libtpu: 0.0.40
codegen_flags: <defaults>
</compile_context>

<pallas_src>
import functools

import jax
import jax.numpy as jnp
from jax.experimental import pallas as pl
from jax.experimental.pallas import tpu as pltpu

_LANE = 128
_SUB = 8


def _hsv_feature_kernel(x_ref, o_ref, acc_ref, scale_ref, *, tile_rows):
    # x_ref block: (1, 3, tile_rows, 128) -> each channel is a dense 2D tile.
    p = pl.program_id(1)   # 0: accumulate sum-of-squares, 1: scale & write
    t = pl.program_id(2)   # spatial tile index

    r = x_ref[0, 0]
    g = x_ref[0, 1]
    b = x_ref[0, 2]

    max_rgb = jnp.maximum(jnp.maximum(r, g), b)
    min_rgb = jnp.minimum(jnp.minimum(r, g), b)
    diff = max_rgb - min_rgb

    # Hoisted predicates (reused below).
    pos = max_rgb > 0.0
    has = diff > 0.0
    is_b = (max_rgb == b) & has
    is_g = (max_rgb == g) & has

    # Divides -> EUP reciprocals (separate VLIW slot, ~free).
    inv_max = pl.reciprocal(jnp.where(pos, max_rgb, 1.0), approx=True)
    inv_diff = pl.reciprocal(jnp.where(has, diff, 1.0), approx=True)

    v = max_rgb
    s = jnp.where(pos, diff * inv_max, 0.0)

    # Collapse the three hue branches: pick numerator & offset, one mul + add.
    # Priority matches the PyTorch sequential writes: b > g > r.
    num = jnp.where(is_b, r - g, jnp.where(is_g, b - r, g - b))
    off = jnp.where(is_b, 4.0, jnp.where(is_g, 2.0, 0.0))
    x = num * inv_diff
    # r-branch uses mod-6; since (g-b)/diff is in [-1, 1] there, mod 6 is just
    # a conditional +6.  (Spurious adds where `has` is False are zeroed below.)
    wrap = jnp.where((~is_b) & (~is_g) & (x < 0.0), 6.0, 0.0)
    h = jnp.where(has, (x + off + wrap) * (1.0 / 6.0), 0.0)

    hsv = (h, s, v)

    # ---- pass 0: accumulate per-channel sum of squares -----------------
    @pl.when(p == 0)
    def _():
        @pl.when(t == 0)
        def _():
            acc_ref[...] = jnp.zeros_like(acc_ref)

        for c in range(3):
            sq = hsv[c] * hsv[c]
            # Fold (tile_rows, 128) -> (8, 128) with plain VPU adds; the
            # reshape splits exactly on (8,128) tile boundaries (no copy).
            part = sq.reshape(tile_rows // _SUB, _SUB, _LANE).sum(axis=0)
            acc_ref[c] += part

    # ---- pass 1: finalize norms once, then scale & write ---------------
    @pl.when(p == 1)
    def _():
        @pl.when(t == 0)
        def _():
            for c in range(3):
                ssq = jnp.sum(acc_ref[c], axis=1, keepdims=True)   # (8, 1)  XLU
                ssq = jnp.sum(ssq, axis=0, keepdims=True)          # (1, 1)
                # F.normalize: x / max(||x||_2, 1e-12); exact (once per image).
                inv_norm = 1.0 / jnp.maximum(jnp.sqrt(ssq), 1e-12)
                scale_ref[c] = jnp.broadcast_to(inv_norm, (1, _LANE))

        for c in range(3):
            o_ref[0, c] = (hsv[c] * scale_ref[c]).astype(o_ref.dtype)


def feature_extractor_hsv(image, *, tile_rows=512):
    """image: (B, 3, H, W) float32 RGB in [0, 1].

    Returns (color, brightness) with shapes (B, 2, H, W) and (B, 1, H, W),
    matching FeatureExtractor(method='hsv', normalize=True).forward.
    """
    B, C, H, W = image.shape
    assert C == 3, "rgb_to_hsv expects 3 input channels"
    HW = H * W

    # Dense lane layout: pad HW up to a multiple of tile_rows*128 with zeros
    # (zeros map to h=s=v=0, so they do not affect the L2 norms).
    r_raw = -(-HW // _LANE)
    tr = min(tile_rows, ((r_raw + _SUB - 1) // _SUB) * _SUB)
    r_pad = ((r_raw + tr - 1) // tr) * tr
    hw_pad = r_pad * _LANE
    n_tiles = r_pad // tr

    x = image.reshape(B, C, HW)
    if hw_pad != HW:
        x = jnp.pad(x, ((0, 0), (0, 0), (0, hw_pad - HW)))
    x = x.reshape(B, C, r_pad, _LANE)

    kernel = functools.partial(_hsv_feature_kernel, tile_rows=tr)

    hsv = pl.pallas_call(
        kernel,
        out_shape=jax.ShapeDtypeStruct((B, 3, r_pad, _LANE), image.dtype),
        grid_spec=pltpu.PrefetchScalarGridSpec(
            num_scalar_prefetch=0,
            grid=(B, 2, n_tiles),                    # (batch, pass, spatial tile)
            in_specs=[
                pl.BlockSpec((1, 3, tr, _LANE), lambda b, p, t: (b, 0, t, 0)),
            ],
            # During pass 0 nothing is written; keep the output block parked at
            # tile 0 (t * p == 0) so no garbage is flushed to HBM.
            out_specs=pl.BlockSpec((1, 3, tr, _LANE),
                                   lambda b, p, t: (b, 0, t * p, 0)),
            scratch_shapes=[
                pltpu.VMEM((3, _SUB, _LANE), jnp.float32),   # sum-of-squares acc
                pltpu.VMEM((3, 1, _LANE), jnp.float32),      # per-channel 1/norm
            ],
        ),
        compiler_params=pltpu.CompilerParams(
            dimension_semantics=("parallel", "arbitrary", "arbitrary")),
        cost_estimate=pl.CostEstimate(
            flops=int(80 * B * hw_pad),
            transcendentals=int(4 * B * hw_pad),
            bytes_accessed=int(36 * B * hw_pad)),
    )(x)

    hsv = hsv.reshape(B, 3, hw_pad)[:, :, :HW].reshape(B, 3, H, W)
    return hsv[:, :2], hsv[:, 2:3]


def _reference_hsv_features(image):
    """Pure-JAX reference mirroring the PyTorch module (exact divides)."""
    r, g, b = image[:, 0], image[:, 1], image[:, 2]
    max_rgb = jnp.max(image, axis=1)
    min_rgb = jnp.min(image, axis=1)
    diff = max_rgb - min_rgb
    v = max_rgb
    s = jnp.where(max_rgb > 0, diff / jnp.where(max_rgb > 0, max_rgb, 1.0), 0.0)
    has = diff > 0
    sd = jnp.where(has, diff, 1.0)
    h = jnp.where((max_rgb == b) & has, (r - g) / sd + 4.0,
        jnp.where((max_rgb == g) & has, (b - r) / sd + 2.0,
        jnp.where((max_rgb == r) & has, jnp.mod((g - b) / sd, 6.0), 0.0)))
    h = h / 6.0
    color = jnp.stack([h, s], axis=1)
    bright = v[:, None]

    def norm(x):
        B, C = x.shape[:2]
        flat = x.reshape(B, C, -1)
        n = jnp.sqrt(jnp.sum(flat * flat, axis=2, keepdims=True))
        return (flat / jnp.maximum(n, 1e-12)).reshape(x.shape)

    return norm(color), norm(bright)


if __name__ == "__main__":
    key = jax.random.PRNGKey(0)
    B, C, H, W = 2, 3, 16, 16  # RGB image batch
    image = jax.random.uniform(key, (B, C, H, W), dtype=jnp.float32)

    color, brightness = feature_extractor_hsv(image)
    jax.block_until_ready(color)
    jax.block_until_ready(brightness)

    ref_color, ref_bright = _reference_hsv_features(image)
    assert color.shape == (B, 2, H, W) and brightness.shape == (B, 1, H, W)
    # Approx EUP reciprocals (~2^-12 relative) vs the exact-divide reference.
    assert jnp.allclose(color, ref_color, atol=5e-3, rtol=5e-3), \
        float(jnp.max(jnp.abs(color - ref_color)))
    assert jnp.allclose(brightness, ref_bright, atol=5e-3, rtol=5e-3), \
        float(jnp.max(jnp.abs(brightness - ref_bright)))

    print("KERNEL_OK")
</pallas_src>

<mosaic_0001>
module attributes {stable_mosaic.version = 11 : i64} {
  func.func @_hsv_feature_kernel(%arg0: i32, %arg1: i32, %arg2: i32, %arg3: memref<1x3x8x128xf32, #tpu.memory_space<vmem>>, %arg4: memref<1x3x8x128xf32, #tpu.memory_space<vmem>>, %arg5: memref<3x8x128xf32, #tpu.memory_space<vmem>>, %arg6: memref<3x1x128xf32, #tpu.memory_space<vmem>>) attributes {dimension_semantics = [#tpu.dimension_semantics<parallel>, #tpu.dimension_semantics<arbitrary>, #tpu.dimension_semantics<arbitrary>], iteration_bounds = array<i64: 2, 2, 1>, scalar_prefetch = 0 : i64, scratch_operands = 2 : i64, tpu.core_type = #tpu.core_type<tc>, window_params = [{transform_indices = @transform_0, window_bounds = array<i64: 1, 3, 8, 128>}, {transform_indices = @transform_1, window_bounds = array<i64: 1, 3, 8, 128>}]} {
    %c0 = arith.constant 0 : index
    %c0_0 = arith.constant 0 : index
    %c0_1 = arith.constant 0 : index
    %c0_2 = arith.constant 0 : index
    %0 = vector.load %arg3[%c0, %c0_0, %c0_1, %c0_2] : memref<1x3x8x128xf32, #tpu.memory_space<vmem>>, vector<1x1x8x128xf32>
    %1 = vector.shape_cast %0 : vector<1x1x8x128xf32> to vector<8x128xf32>
    %c0_3 = arith.constant 0 : index
    %c1 = arith.constant 1 : index
    %c0_4 = arith.constant 0 : index
    %c0_5 = arith.constant 0 : index
    %2 = vector.load %arg3[%c0_3, %c1, %c0_4, %c0_5] : memref<1x3x8x128xf32, #tpu.memory_space<vmem>>, vector<1x1x8x128xf32>
    %3 = vector.shape_cast %2 : vector<1x1x8x128xf32> to vector<8x128xf32>
    %c0_6 = arith.constant 0 : index
    %c2 = arith.constant 2 : index
    %c0_7 = arith.constant 0 : index
    %c0_8 = arith.constant 0 : index
    %4 = vector.load %arg3[%c0_6, %c2, %c0_7, %c0_8] : memref<1x3x8x128xf32, #tpu.memory_space<vmem>>, vector<1x1x8x128xf32>
    %5 = vector.shape_cast %4 : vector<1x1x8x128xf32> to vector<8x128xf32>
    %6 = arith.maximumf %1, %3 : vector<8x128xf32>
    %7 = arith.maximumf %6, %5 : vector<8x128xf32>
    %8 = arith.minimumf %1, %3 : vector<8x128xf32>
    %9 = arith.minimumf %8, %5 : vector<8x128xf32>
    %10 = arith.subf %7, %9 : vector<8x128xf32>
    %cst = arith.constant 0.000000e+00 : f32
    %11 = vector.broadcast %cst : f32 to vector<8x128xf32>
    %12 = arith.cmpf ogt, %7, %11 : vector<8x128xf32>
    %cst_9 = arith.constant 0.000000e+00 : f32
    %13 = vector.broadcast %cst_9 : f32 to vector<8x128xf32>
    %14 = arith.cmpf ogt, %10, %13 : vector<8x128xf32>
    %15 = arith.cmpf oeq, %7, %5 : vector<8x128xf32>
    %16 = arith.andi %15, %14 : vector<8x128xi1>
    %17 = arith.cmpf oeq, %7, %3 : vector<8x128xf32>
    %18 = arith.andi %17, %14 : vector<8x128xi1>
    %cst_10 = arith.constant 1.000000e+00 : f32
    %19 = vector.broadcast %cst_10 : f32 to vector<8x128xf32>
    %20 = arith.select %12, %7, %19 : vector<8x128xi1>, vector<8x128xf32>
    %21 = tpu.reciprocal %20 {approx = true} : vector<8x128xf32> -> vector<8x128xf32>
    %cst_11 = arith.constant 1.000000e+00 : f32
    %22 = vector.broadcast %cst_11 : f32 to vector<8x128xf32>
    %23 = arith.select %14, %10, %22 : vector<8x128xi1>, vector<8x128xf32>
    %24 = tpu.reciprocal %23 {approx = true} : vector<8x128xf32> -> vector<8x128xf32>
    %25 = arith.mulf %10, %21 : vector<8x128xf32>
    %cst_12 = arith.constant 0.000000e+00 : f32
    %26 = vector.broadcast %cst_12 : f32 to vector<8x128xf32>
    %27 = arith.select %12, %25, %26 : vector<8x128xi1>, vector<8x128xf32>
    %28 = arith.subf %1, %3 : vector<8x128xf32>
    %29 = arith.subf %5, %1 : vector<8x128xf32>
    %30 = arith.subf %3, %5 : vector<8x128xf32>
    %31 = arith.select %18, %29, %30 : vector<8x128xi1>, vector<8x128xf32>
    %32 = arith.select %16, %28, %31 : vector<8x128xi1>, vector<8x128xf32>
    %cst_13 = arith.constant 2.000000e+00 : f32
    %cst_14 = arith.constant 0.000000e+00 : f32
    %33 = vector.broadcast %cst_13 : f32 to vector<8x128xf32>
    %34 = vector.broadcast %cst_14 : f32 to vector<8x128xf32>
    %35 = arith.select %18, %33, %34 : vector<8x128xi1>, vector<8x128xf32>
    %cst_15 = arith.constant 4.000000e+00 : f32
    %36 = vector.broadcast %cst_15 : f32 to vector<8x128xf32>
    %37 = arith.select %16, %36, %35 : vector<8x128xi1>, vector<8x128xf32>
    %38 = arith.mulf %32, %24 : vector<8x128xf32>
    %cst_16 = arith.constant dense<true> : vector<8x128xi1>
    %39 = arith.xori %16, %cst_16 : vector<8x128xi1>
    %cst_17 = arith.constant dense<true> : vector<8x128xi1>
    %40 = arith.xori %18, %cst_17 : vector<8x128xi1>
    %41 = arith.andi %39, %40 : vector<8x128xi1>
    %cst_18 = arith.constant 0.000000e+00 : f32
    %42 = vector.broadcast %cst_18 : f32 to vector<8x128xf32>
    %43 = arith.cmpf olt, %38, %42 : vector<8x128xf32>
    %44 = arith.andi %41, %43 : vector<8x128xi1>
    %cst_19 = arith.constant 6.000000e+00 : f32
    %cst_20 = arith.constant 0.000000e+00 : f32
    %45 = vector.broadcast %cst_19 : f32 to vector<8x128xf32>
    %46 = vector.broadcast %cst_20 : f32 to vector<8x128xf32>
    %47 = arith.select %44, %45, %46 : vector<8x128xi1>, vector<8x128xf32>
    %48 = arith.addf %38, %37 : vector<8x128xf32>
    %49 = arith.addf %48, %47 : vector<8x128xf32>
    %cst_21 = arith.constant 0.166666672 : f32
    %50 = vector.broadcast %cst_21 : f32 to vector<8x128xf32>
    %51 = arith.mulf %49, %50 : vector<8x128xf32>
    %cst_22 = arith.constant 0.000000e+00 : f32
    %52 = vector.broadcast %cst_22 : f32 to vector<8x128xf32>
    %53 = arith.select %14, %51, %52 : vector<8x128xi1>, vector<8x128xf32>
    %c0_i32 = arith.constant 0 : i32
    %54 = arith.cmpi eq, %arg1, %c0_i32 : i32
    %55 = arith.extui %54 : i1 to i32
    %c0_i32_23 = arith.constant 0 : i32
    %56 = arith.cmpi ne, %55, %c0_i32_23 : i32
    scf.if %56 {
      %c0_i32_25 = arith.constant 0 : i32
      %60 = arith.cmpi eq, %arg2, %c0_i32_25 : i32
      %61 = arith.extui %60 : i1 to i32
      %c0_i32_26 = arith.constant 0 : i32
      %62 = arith.cmpi ne, %61, %c0_i32_26 : i32
      scf.if %62 {
        %cst_48 = arith.constant 0.000000e+00 : f32
        %90 = vector.broadcast %cst_48 : f32 to vector<3x8x128xf32>
        %c0_49 = arith.constant 0 : index
        %c0_50 = arith.constant 0 : index
        %c0_51 = arith.constant 0 : index
        %91 = vector.load %arg5[%c0_49, %c0_50, %c0_51] : memref<3x8x128xf32, #tpu.memory_space<vmem>>, vector<3x8x128xf32>
        tpu.vector_store %arg5[%c0_49, %c0_50, %c0_51], %90 {strides = array<i32>} : memref<3x8x128xf32, #tpu.memory_space<vmem>>, vector<3x8x128xf32>,
      } else {
      }
      %63 = arith.mulf %53, %53 : vector<8x128xf32>
      %64 = vector.shape_cast %63 : vector<8x128xf32> to vector<1x8x128xf32>
      %cst_27 = arith.constant dense<0.000000e+00> : vector<8x128xf32>
      %65 = vector.multi_reduction <add>, %64, %cst_27 [0] : vector<1x8x128xf32> to vector<8x128xf32>
      %c0_28 = arith.constant 0 : index
      %c0_29 = arith.constant 0 : index
      %c0_30 = arith.constant 0 : index
      %66 = vector.load %arg5[%c0_28, %c0_29, %c0_30] : memref<3x8x128xf32, #tpu.memory_space<vmem>>, vector<1x8x128xf32>
      %67 = vector.shape_cast %66 : vector<1x8x128xf32> to vector<8x128xf32>
      %68 = arith.addf %67, %65 : vector<8x128xf32>
      %c0_31 = arith.constant 0 : index
      %c0_32 = arith.constant 0 : index
      %c0_33 = arith.constant 0 : index
      %69 = vector.load %arg5[%c0_31, %c0_32, %c0_33] : memref<3x8x128xf32, #tpu.memory_space<vmem>>, vector<1x8x128xf32>
      %70 = vector.shape_cast %69 : vector<1x8x128xf32> to vector<8x128xf32>
      %71 = vector.shape_cast %68 : vector<8x128xf32> to vector<1x8x128xf32>
      tpu.vector_store %arg5[%c0_31, %c0_32, %c0_33], %71 {strides = array<i32>} : memref<3x8x128xf32, #tpu.memory_space<vmem>>, vector<1x8x128xf32>,
      %72 = arith.mulf %27, %27 : vector<8x128xf32>
      %73 = vector.shape_cast %72 : vector<8x128xf32> to vector<1x8x128xf32>
      %cst_34 = arith.constant dense<0.000000e+00> : vector<8x128xf32>
      %74 = vector.multi_reduction <add>, %73, %cst_34 [0] : vector<1x8x128xf32> to vector<8x128xf32>
      %c1_35 = arith.constant 1 : index
      %c0_36 = arith.constant 0 : index
      %c0_37 = arith.constant 0 : index
      %75 = vector.load %arg5[%c1_35, %c0_36, %c0_37] : memref<3x8x128xf32, #tpu.memory_space<vmem>>, vector<1x8x128xf32>
      %76 = vector.shape_cast %75 : vector<1x8x128xf32> to vector<8x128xf32>
      %77 = arith.addf %76, %74 : vector<8x128xf32>
      %c1_38 = arith.constant 1 : index
      %c0_39 = arith.constant 0 : index
      %c0_40 = arith.constant 0 : index
      %78 = vector.load %arg5[%c1_38, %c0_39, %c0_40] : memref<3x8x128xf32, #tpu.memory_space<vmem>>, vector<1x8x128xf32>
      %79 = vector.shape_cast %78 : vector<1x8x128xf32> to vector<8x128xf32>
      %80 = vector.shape_cast %77 : vector<8x128xf32> to vector<1x8x128xf32>
      tpu.vector_store %arg5[%c1_38, %c0_39, %c0_40], %80 {strides = array<i32>} : memref<3x8x128xf32, #tpu.memory_space<vmem>>, vector<1x8x128xf32>,
      %81 = arith.mulf %7, %7 : vector<8x128xf32>
      %82 = vector.shape_cast %81 : vector<8x128xf32> to vector<1x8x128xf32>
      %cst_41 = arith.constant dense<0.000000e+00> : vector<8x128xf32>
      %83 = vector.multi_reduction <add>, %82, %cst_41 [0] : vector<1x8x128xf32> to vector<8x128xf32>
      %c2_42 = arith.constant 2 : index
      %c0_43 = arith.constant 0 : index
      %c0_44 = arith.constant 0 : index
      %84 = vector.load %arg5[%c2_42, %c0_43, %c0_44] : memref<3x8x128xf32, #tpu.memory_space<vmem>>, vector<1x8x128xf32>
      %85 = vector.shape_cast %84 : vector<1x8x128xf32> to vector<8x128xf32>
      %86 = arith.addf %85, %83 : vector<8x128xf32>
      %c2_45 = arith.constant 2 : index
      %c0_46 = arith.constant 0 : index
      %c0_47 = arith.constant 0 : index
      %87 = vector.load %arg5[%c2_45, %c0_46, %c0_47] : memref<3x8x128xf32, #tpu.memory_space<vmem>>, vector<1x8x128xf32>
      %88 = vector.shape_cast %87 : vector<1x8x128xf32> to vector<8x128xf32>
      %89 = vector.shape_cast %86 : vector<8x128xf32> to vector<1x8x128xf32>
      tpu.vector_store %arg5[%c2_45, %c0_46, %c0_47], %89 {strides = array<i32>} : memref<3x8x128xf32, #tpu.memory_space<vmem>>, vector<1x8x128xf32>,
    } else {
    }
    %c1_i32 = arith.constant 1 : i32
    %57 = arith.cmpi eq, %arg1, %c1_i32 : i32
    %58 = arith.extui %57 : i1 to i32
    %c0_i32_24 = arith.constant 0 : i32
    %59 = arith.cmpi ne, %58, %c0_i32_24 : i32
    scf.if %59 {
      %c0_i32_25 = arith.constant 0 : i32
      %60 = arith.cmpi eq, %arg2, %c0_i32_25 : i32
      %61 = arith.extui %60 : i1 to i32
      %c0_i32_26 = arith.constant 0 : i32
      %62 = arith.cmpi ne, %61, %c0_i32_26 : i32
      scf.if %62 {
        %c0_48 = arith.constant 0 : index
        %c0_49 = arith.constant 0 : index
        %c0_50 = arith.constant 0 : index
        %84 = vector.load %arg5[%c0_48, %c0_49, %c0_50] : memref<3x8x128xf32, #tpu.memory_space<vmem>>, vector<1x8x128xf32>
        %85 = vector.shape_cast %84 : vector<1x8x128xf32> to vector<8x128xf32>
        %cst_51 = arith.constant dense<0.000000e+00> : vector<8xf32>
        %86 = vector.multi_reduction <add>, %85, %cst_51 [1] : vector<8x128xf32> to vector<8xf32>
        %87 = vector.shape_cast %86 : vector<8xf32> to vector<8x1xf32>
        %cst_52 = arith.constant dense<0.000000e+00> : vector<1xf32>
        %88 = vector.multi_reduction <add>, %87, %cst_52 [0] : vector<8x1xf32> to vector<1xf32>
        %89 = vector.shape_cast %88 : vector<1xf32> to vector<1x1xf32>
        %90 = math.sqrt %89 : vector<1x1xf32>
        %cst_53 = arith.constant 9.99999996E-13 : f32
        %91 = vector.broadcast %cst_53 : f32 to vector<1x1xf32>
        %92 = arith.maximumf %90, %91 : vector<1x1xf32>
        %cst_54 = arith.constant 1.000000e+00 : f32
        %93 = vector.broadcast %cst_54 : f32 to vector<1x1xf32>
        %94 = arith.divf %93, %92 : vector<1x1xf32>
        %95 = vector.shape_cast %94 : vector<1x1xf32> to vector<1x1xf32>
        %96 = vector.broadcast %95 : vector<1x1xf32> to vector<1x128xf32>
        %c0_55 = arith.constant 0 : index
        %c0_56 = arith.constant 0 : index
        %c0_57 = arith.constant 0 : index
        %97 = vector.load %arg6[%c0_55, %c0_56, %c0_57] : memref<3x1x128xf32, #tpu.memory_space<vmem>>, vector<1x1x128xf32>
        %98 = vector.shape_cast %97 : vector<1x1x128xf32> to vector<1x128xf32>
        %99 = vector.shape_cast %96 : vector<1x128xf32> to vector<1x1x128xf32>
        tpu.vector_store %arg6[%c0_55, %c0_56, %c0_57], %99 {strides = array<i32>} : memref<3x1x128xf32, #tpu.memory_space<vmem>>, vector<1x1x128xf32>,
        %c1_58 = arith.constant 1 : index
        %c0_59 = arith.constant 0 : index
        %c0_60 = arith.constant 0 : index
        %100 = vector.load %arg5[%c1_58, %c0_59, %c0_60] : memref<3x8x128xf32, #tpu.memory_space<vmem>>, vector<1x8x128xf32>
        %101 = vector.shape_cast %100 : vector<1x8x128xf32> to vector<8x128xf32>
        %cst_61 = arith.constant dense<0.000000e+00> : vector<8xf32>
        %102 = vector.multi_reduction <add>, %101, %cst_61 [1] : vector<8x128xf32> to vector<8xf32>
        %103 = vector.shape_cast %102 : vector<8xf32> to vector<8x1xf32>
        %cst_62 = arith.constant dense<0.000000e+00> : vector<1xf32>
        %104 = vector.multi_reduction <add>, %103, %cst_62 [0] : vector<8x1xf32> to vector<1xf32>
        %105 = vector.shape_cast %104 : vector<1xf32> to vector<1x1xf32>
        %106 = math.sqrt %105 : vector<1x1xf32>
        %cst_63 = arith.constant 9.99999996E-13 : f32
        %107 = vector.broadcast %cst_63 : f32 to vector<1x1xf32>
        %108 = arith.maximumf %106, %107 : vector<1x1xf32>
        %cst_64 = arith.constant 1.000000e+00 : f32
        %109 = vector.broadcast %cst_64 : f32 to vector<1x1xf32>
        %110 = arith.divf %109, %108 : vector<1x1xf32>
        %111 = vector.shape_cast %110 : vector<1x1xf32> to vector<1x1xf32>
        %112 = vector.broadcast %111 : vector<1x1xf32> to vector<1x128xf32>
        %c1_65 = arith.constant 1 : index
        %c0_66 = arith.constant 0 : index
        %c0_67 = arith.constant 0 : index
        %113 = vector.load %arg6[%c1_65, %c0_66, %c0_67] : memref<3x1x128xf32, #tpu.memory_space<vmem>>, vector<1x1x128xf32>
        %114 = vector.shape_cast %113 : vector<1x1x128xf32> to vector<1x128xf32>
        %115 = vector.shape_cast %112 : vector<1x128xf32> to vector<1x1x128xf32>
        tpu.vector_store %arg6[%c1_65, %c0_66, %c0_67], %115 {strides = array<i32>} : memref<3x1x128xf32, #tpu.memory_space<vmem>>, vector<1x1x128xf32>,
        %c2_68 = arith.constant 2 : index
        %c0_69 = arith.constant 0 : index
        %c0_70 = arith.constant 0 : index
        %116 = vector.load %arg5[%c2_68, %c0_69, %c0_70] : memref<3x8x128xf32, #tpu.memory_space<vmem>>, vector<1x8x128xf32>
        %117 = vector.shape_cast %116 : vector<1x8x128xf32> to vector<8x128xf32>
        %cst_71 = arith.constant dense<0.000000e+00> : vector<8xf32>
        %118 = vector.multi_reduction <add>, %117, %cst_71 [1] : vector<8x128xf32> to vector<8xf32>
        %119 = vector.shape_cast %118 : vector<8xf32> to vector<8x1xf32>
        %cst_72 = arith.constant dense<0.000000e+00> : vector<1xf32>
        %120 = vector.multi_reduction <add>, %119, %cst_72 [0] : vector<8x1xf32> to vector<1xf32>
        %121 = vector.shape_cast %120 : vector<1xf32> to vector<1x1xf32>
        %122 = math.sqrt %121 : vector<1x1xf32>
        %cst_73 = arith.constant 9.99999996E-13 : f32
        %123 = vector.broadcast %cst_73 : f32 to vector<1x1xf32>
        %124 = arith.maximumf %122, %123 : vector<1x1xf32>
        %cst_74 = arith.constant 1.000000e+00 : f32
        %125 = vector.broadcast %cst_74 : f32 to vector<1x1xf32>
        %126 = arith.divf %125, %124 : vector<1x1xf32>
        %127 = vector.shape_cast %126 : vector<1x1xf32> to vector<1x1xf32>
        %128 = vector.broadcast %127 : vector<1x1xf32> to vector<1x128xf32>
        %c2_75 = arith.constant 2 : index
        %c0_76 = arith.constant 0 : index
        %c0_77 = arith.constant 0 : index
        %129 = vector.load %arg6[%c2_75, %c0_76, %c0_77] : memref<3x1x128xf32, #tpu.memory_space<vmem>>, vector<1x1x128xf32>
        %130 = vector.shape_cast %129 : vector<1x1x128xf32> to vector<1x128xf32>
        %131 = vector.shape_cast %128 : vector<1x128xf32> to vector<1x1x128xf32>
        tpu.vector_store %arg6[%c2_75, %c0_76, %c0_77], %131 {strides = array<i32>} : memref<3x1x128xf32, #tpu.memory_space<vmem>>, vector<1x1x128xf32>,
      } else {
      }
      %c0_27 = arith.constant 0 : index
      %c0_28 = arith.constant 0 : index
      %c0_29 = arith.constant 0 : index
      %63 = vector.load %arg6[%c0_27, %c0_28, %c0_29] : memref<3x1x128xf32, #tpu.memory_space<vmem>>, vector<1x1x128xf32>
      %64 = vector.shape_cast %63 : vector<1x1x128xf32> to vector<1x128xf32>
      %65 = vector.broadcast %64 : vector<1x128xf32> to vector<8x128xf32>
      %66 = arith.mulf %53, %65 : vector<8x128xf32>
      %c0_30 = arith.constant 0 : index
      %c0_31 = arith.constant 0 : index
      %c0_32 = arith.constant 0 : index
      %c0_33 = arith.constant 0 : index
      %67 = vector.load %arg4[%c0_30, %c0_31, %c0_32, %c0_33] : memref<1x3x8x128xf32, #tpu.memory_space<vmem>>, vector<1x1x8x128xf32>
      %68 = vector.shape_cast %67 : vector<1x1x8x128xf32> to vector<8x128xf32>
      %69 = vector.shape_cast %66 : vector<8x128xf32> to vector<1x1x8x128xf32>
      tpu.vector_store %arg4[%c0_30, %c0_31, %c0_32, %c0_33], %69 {strides = array<i32>} : memref<1x3x8x128xf32, #tpu.memory_space<vmem>>, vector<1x1x8x128xf32>,
      %c1_34 = arith.constant 1 : index
      %c0_35 = arith.constant 0 : index
      %c0_36 = arith.constant 0 : index
      %70 = vector.load %arg6[%c1_34, %c0_35, %c0_36] : memref<3x1x128xf32, #tpu.memory_space<vmem>>, vector<1x1x128xf32>
      %71 = vector.shape_cast %70 : vector<1x1x128xf32> to vector<1x128xf32>
      %72 = vector.broadcast %71 : vector<1x128xf32> to vector<8x128xf32>
      %73 = arith.mulf %27, %72 : vector<8x128xf32>
      %c0_37 = arith.constant 0 : index
      %c1_38 = arith.constant 1 : index
      %c0_39 = arith.constant 0 : index
      %c0_40 = arith.constant 0 : index
      %74 = vector.load %arg4[%c0_37, %c1_38, %c0_39, %c0_40] : memref<1x3x8x128xf32, #tpu.memory_space<vmem>>, vector<1x1x8x128xf32>
      %75 = vector.shape_cast %74 : vector<1x1x8x128xf32> to vector<8x128xf32>
      %76 = vector.shape_cast %73 : vector<8x128xf32> to vector<1x1x8x128xf32>
      tpu.vector_store %arg4[%c0_37, %c1_38, %c0_39, %c0_40], %76 {strides = array<i32>} : memref<1x3x8x128xf32, #tpu.memory_space<vmem>>, vector<1x1x8x128xf32>,
      %c2_41 = arith.constant 2 : index
      %c0_42 = arith.constant 0 : index
      %c0_43 = arith.constant 0 : index
      %77 = vector.load %arg6[%c2_41, %c0_42, %c0_43] : memref<3x1x128xf32, #tpu.memory_space<vmem>>, vector<1x1x128xf32>
      %78 = vector.shape_cast %77 : vector<1x1x128xf32> to vector<1x128xf32>
      %79 = vector.broadcast %78 : vector<1x128xf32> to vector<8x128xf32>
      %80 = arith.mulf %7, %79 : vector<8x128xf32>
      %c0_44 = arith.constant 0 : index
      %c2_45 = arith.constant 2 : index
      %c0_46 = arith.constant 0 : index
      %c0_47 = arith.constant 0 : index
      %81 = vector.load %arg4[%c0_44, %c2_45, %c0_46, %c0_47] : memref<1x3x8x128xf32, #tpu.memory_space<vmem>>, vector<1x1x8x128xf32>
      %82 = vector.shape_cast %81 : vector<1x1x8x128xf32> to vector<8x128xf32>
      %83 = vector.shape_cast %80 : vector<8x128xf32> to vector<1x1x8x128xf32>
      tpu.vector_store %arg4[%c0_44, %c2_45, %c0_46, %c0_47], %83 {strides = array<i32>} : memref<1x3x8x128xf32, #tpu.memory_space<vmem>>, vector<1x1x8x128xf32>,
    } else {
    }
    return
  }
  func.func @transform_0(%arg0: i32, %arg1: i32, %arg2: i32) -> (i32, i32, i32, i32) {
    %c0_i32 = arith.constant 0 : i32
    %c0_i32_0 = arith.constant 0 : i32
    %c0_i32_1 = arith.constant 0 : i32
    return %arg0, %c0_i32, %arg2, %c0_i32_0 : i32, i32, i32, i32
  }
  func.func @transform_1(%arg0: i32, %arg1: i32, %arg2: i32) -> (i32, i32, i32, i32) {
    %0 = arith.muli %arg2, %arg1 : i32
    %c0_i32 = arith.constant 0 : i32
    %c0_i32_0 = arith.constant 0 : i32
    %c0_i32_1 = arith.constant 0 : i32
    return %arg0, %c0_i32, %0, %c0_i32_0 : i32, i32, i32, i32
  }
}

</mosaic_0001>

<bundles_post_ra>
// kernel: tpu_custom_call.1
= control target key start
LH: loop header
LB: loop body
LE: loop exit
PB: predicated region body
PF: predicated region fallthrough
CT: control target
= control target key end

     0   :  { %6 = vsyncpa [#allocation5], 0  ;;  %s946_s0 = inlined_call_operand.hbm [shape: f32[2,3,8,128], index: 0, kind: input, shape index: {}]   ;;  %s947_s1 = inlined_call_operand.hbm [shape: f32[2,3,8,128], index: 1, kind: output, shape index: {}]  }
   0x1   :  { %8 = vsyncpa [#allocation5 + $0x1], 0 }
   0x2   :  { %9 = vsyncpa [#allocation6], 0 }
   0x3   :  { %11 = vsyncpa [#allocation6 + $0x1], 0  ;;  %s758_s6 = smov 0   ;;  %s760_s7 = smov 0  }
   0x4   :  { %s762_s8 = smov 0   ;;  %s764_s9 = smov 0  }
   0x5   :  { %s766_s10 = smov 0   ;;  %s768_s11 = smov 0  }
   0x6   :  { %s770_s12 = smov 0   ;;  %s772_s13 = smov 0  }
   0x7 LB: > { %s489_s14 = sadd.s32 4294967295, %s740_s13   ;;  %s490_s15 = sadd.s32 4294967294, %s740_s13   ;;  %s740_s13 = sphi %s772_s13, %s17_s13   ;;  %s736_s12 = sphi %s770_s12, %s960_s12   ;;  %s732_s11 = sphi %s768_s11, %s959_s11   ;;  %s728_s10 = sphi %s766_s10, %s958_s10   ;;  %s724_s9 = sphi %s764_s9, %s957_s9   ;;  %s720_s8 = sphi %s762_s8, %s956_s8   ;;  %s716_s7 = sphi %s760_s7, %s955_s7   ;;  %s712_s6 = sphi %s758_s6, %s954_s6  }
   0x8   : > { %s32_s16 = sadd.s32 1, %s732_s11  ;;  %s36_s17 = sadd.s32 1, %s736_s12 }
   0x9   : > { %p34_p0 = scmp.ge.s32.totalorder %s32_s16, 2  ;;  %s45_s18 = sadd.s32 1, %s720_s8 }
   0xa   : > { %p52_p1 = scmp.ne.s32.totalorder %s720_s8, %s716_s7  ;;  %p53_p2 = scmp.eq.s32.totalorder %s740_s13, 0 }
   0xb   : > { %s962_s16 = smov (%p34_p0, %s32_s16), 0  ;;  %s964_s17 = smov (!%p34_p0, %s36_s17), %s736_s12 }
   0xc   : > { %p809_p3 = por %p53_p2, %p52_p1  ;;  %p58_p4 = scmp.ne.s32.totalorder %s716_s7, %s712_s6 }
   0xd   : > { %p38_p5 = scmp.ge.s32.totalorder %s964_s17, 2  ;;  %p59_p6 = scmp.eq.s32.totalorder %s489_s14, 0 }
   0xe   : > { %p86_p7 = scmp.eq.s32.totalorder %s489_s14, 3  ;;  %p92_p8 = scmp.eq.s32.totalorder %s490_s15, 3 }
   0xf   : > { %s966_s17 = smov (%p38_p5, %s964_s17), 0  ;;  %p817_p9 = por %p59_p6, %p58_p4 }
  0x10   : > { %p821_p10 = por %p86_p7, %p52_p1  ;;  %s40_s22 = ssub.s32 %s736_s12, %s966_s17 }
  0x11   : > { %p827_p11 = por %p92_p8, %p58_p4  ;;  %p43_p12 = scmp.eq.s32.totalorder %s40_s22, 0 }
  0x12   : > { %p520_p13 = scmp.lt.s32.totalorder %s740_s13, 4  ;;  %s112_s24 = sand.u32 1, %s720_s8  }
  0x13   : > { %s834_s25 = scalar_select %p43_p12, %s720_s8, %s45_s18  }
  0x14   : > { %s504_s26 = smul.u32 24, %s112_s24  ;;  %p513_p0 = pnand %p520_p13, %p809_p3 }
  0x15   : > { %s505_s27 = smul.u32 24, %s736_s12  ;;  %p494_p1 = scmp.ge.s32.totalorder %s740_s13, 1 }
  0x16   : > { %s116_s2 = scalar_lea.vmem [#allocation4], %s504_s26  ;;  %s113_s5 = scalar_lea.sflag [#allocation5], %s112_s24 }
  0x17   : > { %s122_s30 = scalar_lea.hbm %s946_s0, %s505_s27  ;;  %s125_s3 = sshll.u32 %s116_s2, 4  ;;  %s126_s3 = int_to_ptr.vmem [resolvable:$true] %s125_s3 }
  0x18   : > { %s123_s4 = sshll.u32 %s122_s30, 4  ;;  %s742_s14 = smov 128   ;;  %s124_s4 = int_to_ptr.hbm [resolvable:$true] %s123_s4 }
  0x19   : > { %s743_s15 = smov 8   ;;  %p133_p2 = scmp.lt.s32.totalorder %s740_s13, 5 }
  0x1a   : > { %515 = dma.hbm_to_vmem [thread:$0]  (!%p513_p0), %s124_s4, 384, %s126_s3, %s113_s5, %s742_s14, %s742_s14, %s743_s15  }
  0x1b   : > { %p134_p4 = pnand %p494_p1, %p133_p2 }
  0x1c   : > { %s845_s18 = sand.u32 (!%p134_p4), 1, %s716_s7  }
  0x1d   : > { %137 = sbr.rel (%p134_p4) target bundleno = 278 (0x116), region = 24  ;;  %s140_s22 = scalar_lea.sflag (!%p134_p4), [#allocation5], %s845_s18 }
  0x1e   : > { %s506_s19 = smul.u32 (!%p134_p4), 24, %s845_s18 }
  0x20   : > { %s143_s26 = scalar_lea.vmem (!%p134_p4), [#allocation4], %s506_s19 }
  0x22   : > { %703 = dma.done.wait (%p817_p9), %s140_s22, 384  }
  0x23   : > { %705 = vsyncadd (%p817_p9), %s140_s22, 4294966912  ;;  %v164_v0 = vld [vmem:[%s143_s26] sm:$0xff]  ;;  %v495_v1 = vld [vmem:[%s143_s26 + $0x8] sm:$0xff]  ;;  %v744_v15 = vmov 0.0   ;;  %vm745_vm6 = vmmov 1   ;;  %s886_s20 = scalar_lea.vmem [#allocation7], %s506_s19 }
  0x24   : > { %v496_v2 = vld [vmem:[%s143_s26 + $0x10] sm:$0xff]  ;;  %v169_v3 = vmax.f32 %v164_v0, %v495_v1  ;;  %v171_v4 = vmin.f32 %v164_v0, %v495_v1  ;;  %v186_v12 = vsub.f32 %v164_v0, %v495_v1  ;;  %p497_p3 = scmp.ne.s32.totalorder %s724_s9, 0 }
  0x25   : > { %v187_v9 = vsub.f32 %v496_v2, %v164_v0  ;;  %v188_v10 = vsub.f32 %v495_v1, %v496_v2 }
  0x26   : > { %v855_v5 = vmax.f32 %v169_v3, %v496_v2  ;;  %v172_v6 = vmin.f32 %v171_v4, %v496_v2 }
  0x28   : > { %v173_v7 = vsub.f32 %v855_v5, %v172_v6  ;;  %vm174_vm0 = vcmp.gt.f32.partialorder %v855_v5, 0.0  ;;  %vm178_vm1 = vcmp.eq.f32.partialorder %v855_v5, %v495_v1  ;;  %vm176_vm3 = vcmp.eq.f32.partialorder %v855_v5, %v496_v2 }
  0x29   : > { %v180_v8 = vsel %vm174_vm0, %v855_v5, 1.0 }
  0x2a   : > { %vm175_vm2 = vcmp.gt.f32.partialorder %v173_v7, 0.0  ;;  %593 = vrcp.f32 %v180_v8 }
  0x2b   : > { %v182_v11 = vsel %vm175_vm2, %v173_v7, 1.0  ;;  %vm179_vm4 = vmand %vm178_vm1, %vm175_vm2 }
  0x2c   : > { %595 = vrcp.f32 %v182_v11  ;;  %vm867_vm5 = vmand %vm176_vm3, %vm175_vm2  ;;  %v189_v14 = vsel %vm179_vm4, %v187_v9, %v188_v10  ;;  %v191_v16 = vsel %vm179_vm4, 2.0, %v744_v15 }
  0x2d   : > { %vm194_vm7 = vmxor %vm867_vm5, %vm745_vm6  ;;  %v190_v18 = vsel %vm867_vm5, %v186_v12, %v189_v14  ;;  %v192_v21 = vsel %vm867_vm5, 4.0, %v191_v16 }
  0x2e   : > { %vm195_vm8 = vmxor %vm179_vm4, %vm745_vm6 }
  0x2f   : > { %vm196_vm9 = vmand %vm194_vm7, %vm195_vm8 }
  0x30   : > { %v594_v17 = vpop.eup %593 }
  0x31   : > { %v184_v19 = vmul.f32 %v594_v17, %v173_v7 }
  0x32   : > { %v596_v20 = vpop.eup %595 }
  0x33   : > { %v879_v22 = vsel %vm174_vm0, %v184_v19, 0.0  ;;  %v193_v23 = vmul.f32 %v596_v20, %v190_v18 }
  0x35   : > { %vm197_vm10 = vcmp.lt.f32.partialorder %v193_v23, 0.0  ;;  %v200_v24 = vadd.f32 %v193_v23, %v192_v21 }
  0x36   : > { %vm198_vm11 = vmand %vm196_vm9, %vm197_vm10 }
  0x37   : > { %v199_v25 = vsel %vm198_vm11, 6.0, %v744_v15 }
  0x38   : > { %v201_v26 = vadd.f32 %v200_v24, %v199_v25  ;;  %207 = sbr.rel (%p497_p3) target bundleno = 66 (0x42), region = 32 }
  0x3a   : > { %v202_v27 = vmul.f32 0.16666667, %v201_v26 }
  0x3c   : > { %v882_v28 = vsel %vm175_vm2, %v202_v27, 0.0 }
  0x3d   : > { %v215_v29 = vmul.f32 %v882_v28, %v882_v28  ;;  %v220_v30 = vmul.f32 %v879_v22, %v879_v22  ;;  %v226_v31 = vmul.f32 %v855_v5, %v855_v5 }
  0x3f   : > { %219 = vst [vmem:[#allocation2 + $0x10] sm:$0xff] %v215_v29 }
  0x40   : > { %225 = vst [vmem:[#allocation2] sm:$0xff] %v220_v30 }
  0x41   : > { %231 = vst [vmem:[#allocation2 + $0x8] sm:$0xff] %v226_v31 }
  0x42 PF: > { %p498_p5 = scmp.ne.s32.totalorder %s724_s9, 1 }
  0x44   : > { %235 = sbr.rel (%p498_p5) target bundleno = 261 (0x105), region = 40 }
  0x49   : > { %v319_v32 = vld [vmem:[#allocation2 + $0x8] sm:$0xff]  ;;  %v240_v33 = vld [vmem:[#allocation2 + $0x10] sm:$0xff]  ;;  %v279_v34 = vld [vmem:[#allocation2] sm:$0xff] }
  0x4a   : > { %320 = vadd.xlane.f32.xlu1 %v319_v32  ;;  %241 = vadd.xlane.f32.xlu0 %v240_v33 }
  0x52   : > { %280 = vadd.xlane.f32.xlu0 %v279_v34 }
  0xbd   : > { %v321_v35 = vpop.xlane.xlu1 %320  ;;  %v242_v36 = vpop.xlane.xlu0 %241 }
  0xbe   : > { %v322_v37 = vrot.slane %v321_v35, 4  ;;  %v243_v38 = vrot.slane %v242_v36, 4 }
  0xc0   : > { %v323_v39 = vadd.f32 %v322_v37, %v321_v35  ;;  %v244_v40 = vadd.f32 %v243_v38, %v242_v36 }
  0xc2   : > { %v324_v41 = vrot.slane %v323_v39, 2  ;;  %v245_v42 = vrot.slane %v244_v40, 2 }
  0xc4   : > { %v325_v43 = vadd.f32 %v324_v41, %v323_v39  ;;  %v246_v44 = vadd.f32 %v245_v42, %v244_v40 }
  0xc5   : > { %v281_v45 = vpop.xlane.xlu0 %280 }
  0xc6   : > { %v326_v46 = vrot.slane %v325_v43, 1  ;;  %v247_v47 = vrot.slane %v246_v44, 1  ;;  %v282_v48 = vrot.slane %v281_v45, 4 }
  0xc8   : > { %v327_v49 = vadd.f32 %v326_v46, %v325_v43  ;;  %v248_v50 = vadd.f32 %v247_v47, %v246_v44  ;;  %v283_v51 = vadd.f32 %v282_v48, %v281_v45 }
  0xca   : > { %600 = vrsqrt.f32 %v327_v49  ;;  %v284_v52 = vrot.slane %v283_v51, 2  ;;  %vm335_vm12 = vcmp.eq.f32.partialorder %v327_v49, inf  ;;  %vm337_vm13 = vcmp.eq.f32.partialorder %v327_v49, 0.0 }
  0xcb   : > { %602 = vrsqrt.f32 %v248_v50  ;;  %v338_v8 = vand.u32 2147483648, %v327_v49  ;;  %vm256_vm14 = vcmp.eq.f32.partialorder %v248_v50, inf  ;;  %v259_v11 = vand.u32 2147483648, %v248_v50 }
  0xcc   : > { %v285_v53 = vadd.f32 %v284_v52, %v283_v51  ;;  %vm258_vm15 = vcmp.eq.f32.partialorder %v248_v50, 0.0 }
  0xce   : > { %v286_v55 = vrot.slane %v285_v53, 1 }
  0xd0   : > { %v601_v54 = vpop.eup %600  ;;  %v287_v59 = vadd.f32 %v286_v55, %v285_v53 }
  0xd1   : > { %v603_v56 = vpop.eup %602  ;;  %v329_v57 = vmul.f32 %v601_v54, %v327_v49 }
  0xd2   : > { %v250_v58 = vmul.f32 %v603_v56, %v248_v50  ;;  %604 = vrsqrt.f32 %v287_v59  ;;  %vm295_vm0 = vcmp.eq.f32.partialorder %v287_v59, inf  ;;  %v298_v26 = vand.u32 2147483648, %v287_v59 }
  0xd3   : > { %v330_v60 = vmul.f32 %v601_v54, %v329_v57  ;;  %vm297_vm1 = vcmp.eq.f32.partialorder %v287_v59, 0.0 }
  0xd4   : > { %v251_v61 = vmul.f32 %v603_v56, %v250_v58 }
  0xd5   : > { %v331_v62 = vmul.f32 0.5, %v330_v60 }
  0xd6   : > { %v252_v63 = vmul.f32 0.5, %v251_v61 }
  0xd7   : > { %v332_v0 = vsub.f32 1.5, %v331_v62 }
  0xd8   : > { %v253_v1 = vsub.f32 1.5, %v252_v63  ;;  %v605_v3 = vpop.eup %604 }
  0xd9   : > { %v333_v2 = vmul.f32 %v601_v54, %v332_v0  ;;  %v289_v7 = vmul.f32 %v605_v3, %v287_v59 }
  0xda   : > { %v254_v4 = vmul.f32 %v603_v56, %v253_v1 }
  0xdb   : > { %v334_v6 = vmul.f32 %v333_v2, %v327_v49  ;;  %v290_v12 = vmul.f32 %v605_v3, %v289_v7 }
  0xdc   : > { %v255_v9 = vmul.f32 %v254_v4, %v248_v50 }
  0xdd   : > { %v336_v10 = vsel %vm335_vm12, %v327_v49, %v334_v6  ;;  %v291_v17 = vmul.f32 0.5, %v290_v12 }
  0xde   : > { %v339_v13 = vsel %vm337_vm13, %v338_v8, %v336_v10  ;;  %v257_v14 = vsel %vm256_vm14, %v248_v50, %v255_v9 }
  0xdf   : > { %v340_v15 = vmax.f32 %v339_v13, 1e-12  ;;  %v260_v16 = vsel %vm258_vm15, %v259_v11, %v257_v14  ;;  %v292_v19 = vsub.f32 1.5, %v291_v17 }
  0xe0   : > { %v261_v18 = vmax.f32 %v260_v16, 1e-12 }
  0xe1   : > { %606 = vrcp.f32 %v340_v15  ;;  %v293_v20 = vmul.f32 %v605_v3, %v292_v19  ;;  %v352_v32 = vand.u32 2147483648, %v340_v15  ;;  %v350_v36 = vand.u32 2147483647, %v340_v15 }
  0xe2   : > { %608 = vrcp.f32 %v261_v18  ;;  %v273_v37 = vand.u32 2147483648, %v261_v18  ;;  %v271_v39 = vand.u32 2147483647, %v261_v18  ;;  %vm346_vm4 = vweird.f32 %v340_v15 }
  0xe3   : > { %v294_v23 = vmul.f32 %v293_v20, %v287_v59  ;;  %v353_v41 = vor.u32 1.1754944e-38, %v352_v32  ;;  %vm267_vm6 = vweird.f32 %v261_v18  ;;  %vm351_vm7 = vcmp.eq.f32.partialorder %v350_v36, 8.507059e+37 }
  0xe4   : > { %v274_v44 = vor.u32 1.1754944e-38, %v273_v37  ;;  %vm272_vm9 = vcmp.eq.f32.partialorder %v271_v39, 8.507059e+37 }
  0xe5   : > { %v296_v29 = vsel %vm295_vm0, %v287_v59, %v294_v23 }
  0xe6   : > { %v299_v31 = vsel %vm297_vm1, %v298_v26, %v296_v29 }
  0xe7   : > { %v607_v21 = vpop.eup %606  ;;  %v300_v34 = vmax.f32 %v299_v31, 1e-12 }
  0xe8   : > { %v609_v24 = vpop.eup %608  ;;  %v342_v25 = vmul.f32 %v607_v21, %v340_v15  ;;  %vm347_vm2 = vweird.f32 %v607_v21 }
  0xe9   : > { %v263_v27 = vmul.f32 %v609_v24, %v261_v18  ;;  %vm268_vm3 = vweird.f32 %v609_v24  ;;  %610 = vrcp.f32 %v300_v34  ;;  %vm348_vm5 = vmor %vm346_vm4, %vm347_vm2  ;;  %v312_v51 = vand.u32 2147483648, %v300_v34 }
  0xea   : > { %v343_v30 = vsub.f32 1.0, %v342_v25  ;;  %vm269_vm8 = vmor %vm267_vm6, %vm268_vm3  ;;  %v310_v53 = vand.u32 2147483647, %v300_v34  ;;  %vm306_vm11 = vweird.f32 %v300_v34 }
  0xeb   : > { %v264_v33 = vsub.f32 1.0, %v263_v27  ;;  %v313_v58 = vor.u32 1.1754944e-38, %v312_v51 }
  0xec   : > { %v344_v35 = vmul.f32 %v607_v21, %v343_v30  ;;  %vm311_vm13 = vcmp.eq.f32.partialorder %v310_v53, 8.507059e+37 }
  0xed   : > { %v265_v38 = vmul.f32 %v609_v24, %v264_v33 }
  0xee   : > { %v345_v40 = vadd.f32 %v607_v21, %v344_v35 }
  0xef   : > { %v266_v42 = vadd.f32 %v609_v24, %v265_v38  ;;  %v611_v48 = vpop.eup %610 }
  0xf0   : > { %v349_v43 = vsel %vm348_vm5, %v607_v21, %v345_v40  ;;  %v302_v49 = vmul.f32 %v611_v48, %v300_v34  ;;  %vm307_vm10 = vweird.f32 %v611_v48 }
  0xf1   : > { %v354_v45 = vsel %vm351_vm7, %v353_v41, %v349_v43  ;;  %v270_v46 = vsel %vm269_vm8, %v609_v24, %v266_v42  ;;  %vm308_vm12 = vmor %vm306_vm11, %vm307_vm10 }
  0xf2   : > { %357 = vst [vmem:[#allocation3 + $0x2] sm:$0x1] %v354_v45  ;;  %v275_v47 = vsel %vm272_vm9, %v274_v44, %v270_v46  ;;  %v303_v50 = vsub.f32 1.0, %v302_v49 }
  0xf3   : > { %277 = vst [vmem:[#allocation3] sm:$0x1] %v275_v47 }
  0xf4   : > { %v304_v52 = vmul.f32 %v611_v48, %v303_v50 }
  0xf6   : > { %v305_v56 = vadd.f32 %v611_v48, %v304_v52 }
  0xf8   : > { %v309_v60 = vsel %vm308_vm12, %v611_v48, %v305_v56 }
  0xf9   : > { %v597_v54 = vld [vmem:[#allocation3 + $0x2] ss:$0 sm:$0xff]  ;;  %v314_v61 = vsel %vm311_vm13, %v313_v58, %v309_v60 }
  0xfa   : > { %v598_v55 = vld [vmem:[#allocation3] ss:$0 sm:$0xff]  ;;  %v377_v57 = vmul.f32 %v597_v54, %v855_v5  ;;  %317 = vst [vmem:[#allocation3 + $0x1] sm:$0x1] %v314_v61 }
  0xfb   : > { %v362_v59 = vmul.f32 %v598_v55, %v882_v28 }
  0xfc   : > { %500 = vst [vmem:[%s886_s20 + $0x10] sm:$0xff] %v377_v57 }
  0xfd   : > { %363 = vst [vmem:[%s886_s20] sm:$0xff] %v362_v59 }
 0x101   : > { %v599_v62 = vld [vmem:[#allocation3 + $0x1] ss:$0 sm:$0xff] }
 0x102   : > { %v369_v63 = vmul.f32 %v599_v62, %v879_v22 }
 0x104   : > { %499 = vst [vmem:[%s886_s20 + $0x8] sm:$0xff] %v369_v63 }
 0x105 PF: > { %s507_s9 = smul.u32 24, %s728_s10  ;;  %s395_s24 = sshll.u32 %s886_s20, 4  ;;  %s396_s24 = int_to_ptr.vmem [resolvable:$true] %s395_s24 }
 0x106   : > { %s381_s2 = scalar_lea.sflag [#allocation6], %s845_s18  ;;  %s662_s10 = scalar_lea.hbm %s947_s1, 48 }
 0x107   : > { %s394_s29 = scalar_lea.hbm %s947_s1, %s507_s9 }
 0x108   : > { %s397_s30 = sshll.u32 %s394_s29, 4  ;;  %s398_s30 = int_to_ptr.hbm [resolvable:$true] %s397_s30 }
 0x109   : > { %s656_s3 = sshra.s32 %s398_s30, 4  ;;  %s657_s3 = int_to_ptr.hbm [resolvable:$true] %s656_s3 }
 0x10a   : > { %s658_s4 = scalar_lea.hbm %s657_s3, 24  ;;  %p663_p9 = scmp.lt.s32.totalorder %s657_s3, %s947_s1 }
 0x10b   : > { %p659_p6 = scmp.ne.s32.totalorder %s657_s3, %s658_s4  ;;  %p664_p12 = scmp.lt.s32.totalorder %s662_s10, %s658_s4 }
 0x10d   : > { %p660_p7 = pnand %p659_p6, %p821_p10  ;;  %p665_p13 = por %p664_p12, %p663_p9 }
 0x10f   : > { %p661_p8 = pneg %p660_p7 }
 0x111   : > { %p666_p0 = pnand %p665_p13, %p661_p8 }
 0x113   : > { %669 = shalt.err (!%p666_p0)
}
 0x114   : > { %s746_s18 = smov 128   ;;  %s747_s22 = smov 8  }
 0x115   : > { %510 = dma.vmem_to_hbm [thread:$0]  (%p821_p10), %s396_s24, 384, %s398_s30, %s381_s2, %s746_s18, %s746_s18, %s747_s22  }
 0x116 PF: > { %p521_p1 = scmp.ge.s32.totalorder %s740_s13, 2  ;;  %s412_s26 = sand.u32 1, %s712_s6  }
 0x117   : > { %s413_s20 = scalar_lea.sflag [#allocation6], %s412_s26 }
 0x118   : > { %p517_p2 = pnand %p521_p1, %p827_p11 }
 0x11a   : > { %p518_p4 = pneg %p517_p2 }
 0x11c   : > { %707 = dma.done.wait (%p518_p4), %s413_s20, 384  }
 0x11d   : > { %709 = vsyncadd (%p518_p4), %s413_s20, 4294966912  ;;  %s17_s13 = sadd.s32 1, %s740_s13   ;;  %s954_s6 = smov %s716_s7 }
 0x11e   : > { %p14_p3 = scmp.ge.s32.totalorder %s17_s13, 6   ;;  %s955_s7 = smov %s720_s8 }
 0x11f   : > { %s956_s8 = smov %s834_s25  ;;  %s957_s9 = smov %s732_s11 }
 0x120   : > { %s958_s10 = smov %s736_s12  ;;  %s959_s11 = smov %s962_s16 }
 0x121   : > { %s960_s12 = smov %s966_s17  ;;  %16 = sbr.rel (!%p14_p3) target bundleno = 7 (0x7), region = 97 }
 0x126   :  { %419 = vsyncpa [#allocation5], 1 }
 0x127   :  { %421 = vsyncpa [#allocation5 + $0x1], 1 }
 0x128   :  { %422 = vsyncpa [#allocation6], 1 }
 0x129   :  { %424 = vsyncpa [#allocation6 + $0x1], 1 }

</bundles_post_ra>
